<compile_context>
chip_gen: v7x
topology: tpu7x:2x2x1
jax: 0.10.0
libtpu: 0.0.40
codegen_flags: <defaults>
</compile_context>

<pallas_src>
import functools

import jax
import jax.numpy as jnp
from jax import lax
from jax.experimental import pallas as pl
from jax.experimental.pallas import tpu as pltpu

LANES = 128


def _round_up(n: int, m: int) -> int:
    return ((n + m - 1) // m) * m


def _cdiv(a: int, b: int) -> int:
    return (a + b - 1) // b


# ----------------------------------------------------------------------------
# Kernel (feature-major layout: batch lives in the lane dimension)
# ----------------------------------------------------------------------------
def gaussian_mlp_kernel(xT_ref, w0_ref, w1_ref, w2_ref, b0_ref, b1_ref, b2_ref,
                        out_ref, *, hidden, out_dim, fuse_layer1):
    xT = xT_ref[...]                                          # (in_dim, TB)

    # Layer 0, branch-fused along rows: (2h, in) @ (in, TB) -> (2h, TB)
    h = jnp.dot(w0_ref[...], xT, preferred_element_type=jnp.float32)
    h = jnp.maximum(h + b0_ref[...], 0.0)                     # lane-broadcast bias

    # Layer 1
    hc = h.astype(w1_ref.dtype)
    if fuse_layer1:
        # block-diagonal (2h, 2h) fused weight (only when hidden < 128)
        h = jnp.dot(w1_ref[...], hc, preferred_element_type=jnp.float32)
    else:
        # two independent h x h dots: don't double MXU work / W1 bytes
        w1 = w1_ref[...]                                      # (2h, h)
        hm = jnp.dot(w1[:hidden, :], hc[:hidden, :],
                     preferred_element_type=jnp.float32)
        hv = jnp.dot(w1[hidden:, :], hc[hidden:, :],
                     preferred_element_type=jnp.float32)
        h = jnp.concatenate([hm, hv], axis=0)
    h = jnp.maximum(h + b1_ref[...], 0.0)

    # Layer 2, fused: (OUT_ROWS, 2h) @ (2h, TB) -> (OUT_ROWS, TB)
    y = jnp.dot(w2_ref[...], h.astype(w2_ref.dtype),
                preferred_element_type=jnp.float32) + b2_ref[...]

    # rows [0, out_dim)          -> mean (pass through)
    # rows [out_dim, 2*out_dim)  -> variance = exp(log_var)
    # rows beyond                -> sublane padding (dropped in wrapper)
    row = lax.broadcasted_iota(jnp.int32, y.shape, 0)
    out = jnp.where(row < out_dim, y, jnp.exp(y))
    out_ref[...] = out.astype(out_ref.dtype)


# ----------------------------------------------------------------------------
# Parameter fusion / packing (plain JAX glue, runs once per call)
# ----------------------------------------------------------------------------
def _fuse_params(mean_params, logvar_params, out_rows, compute_dtype,
                 fuse_layer1):
    mW0, mb0, mW1, mb1, mW2, mb2 = mean_params
    vW0, vb0, vW1, vb1, vW2, vb2 = logvar_params
    hidden = mW0.shape[1]
    out_dim = mW2.shape[1]

    # Layer 0: rows [0,h) = mean branch, rows [h,2h) = log_var branch.
    W0t = jnp.concatenate([mW0.T, vW0.T], axis=0)                    # (2h, in)

    if fuse_layer1:
        z = jnp.zeros((hidden, hidden), mW1.dtype)
        W1t = jnp.concatenate(
            [jnp.concatenate([mW1.T, z], axis=1),
             jnp.concatenate([z, vW1.T], axis=1)], axis=0)           # (2h, 2h)
    else:
        W1t = jnp.concatenate([mW1.T, vW1.T], axis=0)                # (2h, h)

    W2t = jnp.zeros((out_rows, 2 * hidden), mW2.dtype)
    W2t = W2t.at[:out_dim, :hidden].set(mW2.T)
    W2t = W2t.at[out_dim:2 * out_dim, hidden:].set(vW2.T)            # (OUT_ROWS, 2h)

    b0 = jnp.concatenate([mb0, vb0], axis=1).T                       # (2h, 1)
    b1 = jnp.concatenate([mb1, vb1], axis=1).T                       # (2h, 1)
    b2 = jnp.zeros((out_rows, 1), jnp.float32)
    b2 = b2.at[:out_dim, 0].set(mb2[0]).at[out_dim:2 * out_dim, 0].set(vb2[0])

    return (W0t.astype(compute_dtype), W1t.astype(compute_dtype),
            W2t.astype(compute_dtype), b0.astype(jnp.float32),
            b1.astype(jnp.float32), b2.astype(jnp.float32))


# ----------------------------------------------------------------------------
# Wrapper
# ----------------------------------------------------------------------------
def gaussian_mlp_forward(x, mean_params, logvar_params, *,
                         compute_dtype=jnp.bfloat16, batch_tile=2048):
    """x: (B, input_dim). Each params tuple: (W0, b0, W1, b1, W2, b2) with W
    stored as (in_features, out_features) and b as (1, out_features).
    Returns (mean, variance), both (B, output_dim) float32."""
    B, in_dim = x.shape
    hidden = mean_params[0].shape[1]
    out_dim = mean_params[-2].shape[1]
    H2 = 2 * hidden
    OUT_ROWS = _round_up(2 * out_dim, 8)
    fuse_layer1 = (hidden < 128) or (hidden % 8 != 0)

    W0t, W1t, W2t, b0, b1, b2 = _fuse_params(
        mean_params, logvar_params, OUT_ROWS, compute_dtype, fuse_layer1)

    # ---- batch (lane) tiling -------------------------------------------------
    batch_tile = max(LANES, _round_up(batch_tile, LANES))
    if B <= LANES:
        TB = LANES
    else:
        # >= 2 grid steps so v7x shards lanes over both TensorCores; adaptive
        # tile keeps batch-padding waste bounded for awkward B.
        n_tiles = max(2, _cdiv(B, batch_tile))
        TB = _round_up(_cdiv(B, n_tiles), LANES)
    num_tiles = _cdiv(B, TB)
    padded_B = num_tiles * TB

    xT = x.astype(compute_dtype).T                                   # (in_dim, B)
    if padded_B != B:
        xT = jnp.pad(xT, ((0, 0), (0, padded_B - B)))

    itm = jnp.dtype(compute_dtype).itemsize
    k1 = H2 * H2 if fuse_layer1 else 2 * hidden * hidden
    flops = 2 * padded_B * (in_dim * H2 + k1 + H2 * OUT_ROWS)
    w_bytes = ((W0t.size + W1t.size + W2t.size) * itm
               + (b0.size + b1.size + b2.size) * 4)
    bytes_accessed = (padded_B * in_dim * itm + w_bytes
                      + padded_B * OUT_ROWS * 4)

    # VMEM budget: double-buffered streamed x/out blocks + (double-buffered)
    # resident slabs + activation temporaries.  Raise the scoped limit only
    # when the 32 MiB default would be exceeded (v7x physical VMEM is 64 MiB).
    vmem_need = (2 * in_dim * TB * itm + 2 * OUT_ROWS * TB * 4
                 + 2 * w_bytes + 4 * H2 * TB * 4)
    vmem_limit = None
    if vmem_need + (8 << 20) > (32 << 20):
        vmem_limit = int(min(vmem_need + (16 << 20), 112 << 20))

    kernel = functools.partial(gaussian_mlp_kernel, hidden=hidden,
                               out_dim=out_dim, fuse_layer1=fuse_layer1)

    y = pl.pallas_call(
        kernel,
        out_shape=jax.ShapeDtypeStruct((OUT_ROWS, padded_B), jnp.float32),
        grid_spec=pltpu.PrefetchScalarGridSpec(
            num_scalar_prefetch=0,
            grid=(num_tiles,),
            in_specs=[
                pl.BlockSpec((in_dim, TB), lambda i: (0, i)),        # streams
                pl.BlockSpec(W0t.shape, lambda i: (0, 0)),           # resident
                pl.BlockSpec(W1t.shape, lambda i: (0, 0)),           # resident
                pl.BlockSpec(W2t.shape, lambda i: (0, 0)),           # resident
                pl.BlockSpec(b0.shape, lambda i: (0, 0)),            # resident
                pl.BlockSpec(b1.shape, lambda i: (0, 0)),            # resident
                pl.BlockSpec(b2.shape, lambda i: (0, 0)),            # resident
            ],
            out_specs=pl.BlockSpec((OUT_ROWS, TB), lambda i: (0, i)),
        ),
        compiler_params=pltpu.CompilerParams(
            dimension_semantics=("parallel",),
            vmem_limit_bytes=vmem_limit),
        cost_estimate=pl.CostEstimate(
            flops=flops,
            transcendentals=padded_B * OUT_ROWS,
            bytes_accessed=bytes_accessed),
    )(xT, W0t, W1t, W2t, b0, b1, b2)

    mean = y[:out_dim, :B].T
    var = y[out_dim:2 * out_dim, :B].T
    return mean, var


# ----------------------------------------------------------------------------
# Init + pure-JAX reference
# ----------------------------------------------------------------------------
def init_mlp_params(key, input_dim, hidden_dim, output_dim, n_layers):
    """Deterministic init of an MLP with hidden_layers=[hidden_dim]*n_layers."""
    dims = [input_dim] + [hidden_dim] * n_layers + [output_dim]
    params = []
    for i in range(len(dims) - 1):
        key, wk, bk = jax.random.split(key, 3)
        bound = 1.0 / jnp.sqrt(dims[i])
        W = jax.random.uniform(wk, (dims[i], dims[i + 1]), jnp.float32, -bound, bound)
        b = jax.random.uniform(bk, (1, dims[i + 1]), jnp.float32, -bound, bound)
        params.extend([W, b])
    return tuple(params)


def reference_forward(x, mean_params, logvar_params):
    """Pure-JAX reference (same math as the PyTorch module with ReLU MLPs)."""
    def mlp(x, p):
        W0, b0, W1, b1, W2, b2 = p
        h = jnp.maximum(x @ W0 + b0, 0.0)
        h = jnp.maximum(h @ W1 + b1, 0.0)
        return h @ W2 + b2
    return mlp(x, mean_params), jnp.exp(mlp(x, logvar_params))


if __name__ == "__main__":
    # Shapes consistent with GaussianMLP(input_dim, output_dim, hidden_dim, n_layers=2)
    batch, input_dim, hidden_dim, output_dim, n_layers = 8, 16, 32, 8, 2

    key = jax.random.PRNGKey(0)
    k_x, k_mean, k_var = jax.random.split(key, 3)

    x = jax.random.normal(k_x, (batch, input_dim), jnp.float32)
    mean_params = init_mlp_params(k_mean, input_dim, hidden_dim, output_dim, n_layers)
    logvar_params = init_mlp_params(k_var, input_dim, hidden_dim, output_dim, n_layers)
    ref_mean, ref_var = reference_forward(x, mean_params, logvar_params)

    # Default path: bf16 matmul operands, f32 accumulation / bias / ReLU / exp.
    mean, var = gaussian_mlp_forward(x, mean_params, logvar_params)
    jax.block_until_ready((mean, var))
    assert mean.shape == (batch, output_dim) and var.shape == (batch, output_dim)
    assert jnp.allclose(mean, ref_mean, atol=2e-2, rtol=2e-2)
    assert jnp.allclose(var, ref_var, atol=2e-2, rtol=2e-2)
    assert bool(jnp.all(var > 0))  # variance must be positive (exp of log_var)

    # f32 operands -> tight ground-truth check.
    mean32, var32 = gaussian_mlp_forward(x, mean_params, logvar_params,
                                         compute_dtype=jnp.float32)
    jax.block_until_ready((mean32, var32))
    assert jnp.allclose(mean32, ref_mean, atol=1e-5, rtol=1e-5)
    assert jnp.allclose(var32, ref_var, atol=1e-5, rtol=1e-5)

    # Multi-step lane grid (2 tiles of 256 lanes, last tile partially padded).
    xb = jax.random.normal(jax.random.PRNGKey(1), (384, input_dim), jnp.float32)
    ref_mean2, ref_var2 = reference_forward(xb, mean_params, logvar_params)
    mean2, var2 = gaussian_mlp_forward(xb, mean_params, logvar_params,
                                       compute_dtype=jnp.float32, batch_tile=256)
    jax.block_until_ready((mean2, var2))
    assert mean2.shape == (384, output_dim) and var2.shape == (384, output_dim)
    assert jnp.allclose(mean2, ref_mean2, atol=1e-5, rtol=1e-5)
    assert jnp.allclose(var2, ref_var2, atol=1e-5, rtol=1e-5)

    # TODO(synk): multi-input forward (torch.cat(input, dim=1)), the
    # fixed_mean/fixed_var constant branches, and Normal.sample/log_pdf are
    # plain JAX glue outside the kernel hot path; variable n_layers would need
    # a generalized weight-slab packing (kernel here covers n_layers=2).
    print("KERNEL_OK")
</pallas_src>

<mosaic_0001>
module attributes {stable_mosaic.version = 11 : i64} {
  func.func @gaussian_mlp_kernel(%arg0: i32, %arg1: memref<16x128xbf16, #tpu.memory_space<vmem>>, %arg2: memref<64x16xbf16, #tpu.memory_space<vmem>>, %arg3: memref<64x64xbf16, #tpu.memory_space<vmem>>, %arg4: memref<16x64xbf16, #tpu.memory_space<vmem>>, %arg5: memref<64x1xf32, #tpu.memory_space<vmem>>, %arg6: memref<64x1xf32, #tpu.memory_space<vmem>>, %arg7: memref<16x1xf32, #tpu.memory_space<vmem>>, %arg8: memref<16x128xf32, #tpu.memory_space<vmem>>) attributes {dimension_semantics = [#tpu.dimension_semantics<parallel>], iteration_bounds = array<i64: 1>, scalar_prefetch = 0 : i64, scratch_operands = 0 : i64, tpu.core_type = #tpu.core_type<tc>, window_params = [{transform_indices = @transform_0, window_bounds = array<i64: 16, 128>}, {pipeline_mode = #tpu.pipeline_mode<synchronous>, transform_indices = @transform_1, window_bounds = array<i64: 64, 16>}, {pipeline_mode = #tpu.pipeline_mode<synchronous>, transform_indices = @transform_2, window_bounds = array<i64: 64, 64>}, {pipeline_mode = #tpu.pipeline_mode<synchronous>, transform_indices = @transform_3, window_bounds = array<i64: 16, 64>}, {pipeline_mode = #tpu.pipeline_mode<synchronous>, transform_indices = @transform_4, window_bounds = array<i64: 64, 1>}, {pipeline_mode = #tpu.pipeline_mode<synchronous>, transform_indices = @transform_5, window_bounds = array<i64: 64, 1>}, {pipeline_mode = #tpu.pipeline_mode<synchronous>, transform_indices = @transform_6, window_bounds = array<i64: 16, 1>}, {transform_indices = @transform_7, window_bounds = array<i64: 16, 128>}]} {
    %c0 = arith.constant 0 : index
    %c0_0 = arith.constant 0 : index
    %0 = vector.load %arg1[%c0, %c0_0] : memref<16x128xbf16, #tpu.memory_space<vmem>>, vector<16x128xbf16>
    %c0_1 = arith.constant 0 : index
    %c0_2 = arith.constant 0 : index
    %1 = vector.load %arg2[%c0_1, %c0_2] : memref<64x16xbf16, #tpu.memory_space<vmem>>, vector<64x16xbf16>
    %cst = arith.constant dense<0.000000e+00> : vector<64x128xf32>
    %2 = tpu.matmul %1, %0, %cst {dimension_numbers = #tpu.dot_dimension_numbers<[1], [0], [0], [1], [0, 0, 1, 1], [], []>} : vector<64x16xbf16>, vector<16x128xbf16>, vector<64x128xf32> -> vector<64x128xf32>
    %c0_3 = arith.constant 0 : index
    %c0_4 = arith.constant 0 : index
    %3 = vector.load %arg5[%c0_3, %c0_4] : memref<64x1xf32, #tpu.memory_space<vmem>>, vector<64x1xf32>
    %4 = vector.broadcast %3 : vector<64x1xf32> to vector<64x128xf32>
    %5 = arith.addf %2, %4 : vector<64x128xf32>
    %cst_5 = arith.constant 0.000000e+00 : f32
    %6 = vector.broadcast %cst_5 : f32 to vector<64x128xf32>
    %7 = arith.maximumf %5, %6 : vector<64x128xf32>
    %8 = arith.truncf %7 : vector<64x128xf32> to vector<64x128xbf16>
    %c0_6 = arith.constant 0 : index
    %c0_7 = arith.constant 0 : index
    %9 = vector.load %arg3[%c0_6, %c0_7] : memref<64x64xbf16, #tpu.memory_space<vmem>>, vector<64x64xbf16>
    %cst_8 = arith.constant dense<0.000000e+00> : vector<64x128xf32>
    %10 = tpu.matmul %9, %8, %cst_8 {dimension_numbers = #tpu.dot_dimension_numbers<[1], [0], [0], [1], [0, 0, 1, 1], [], []>} : vector<64x64xbf16>, vector<64x128xbf16>, vector<64x128xf32> -> vector<64x128xf32>
    %c0_9 = arith.constant 0 : index
    %c0_10 = arith.constant 0 : index
    %11 = vector.load %arg6[%c0_9, %c0_10] : memref<64x1xf32, #tpu.memory_space<vmem>>, vector<64x1xf32>
    %12 = vector.broadcast %11 : vector<64x1xf32> to vector<64x128xf32>
    %13 = arith.addf %10, %12 : vector<64x128xf32>
    %cst_11 = arith.constant 0.000000e+00 : f32
    %14 = vector.broadcast %cst_11 : f32 to vector<64x128xf32>
    %15 = arith.maximumf %13, %14 : vector<64x128xf32>
    %c0_12 = arith.constant 0 : index
    %c0_13 = arith.constant 0 : index
    %16 = vector.load %arg4[%c0_12, %c0_13] : memref<16x64xbf16, #tpu.memory_space<vmem>>, vector<16x64xbf16>
    %17 = arith.truncf %15 : vector<64x128xf32> to vector<64x128xbf16>
    %cst_14 = arith.constant dense<0.000000e+00> : vector<16x128xf32>
    %18 = tpu.matmul %16, %17, %cst_14 {dimension_numbers = #tpu.dot_dimension_numbers<[1], [0], [0], [1], [0, 0, 1, 1], [], []>} : vector<16x64xbf16>, vector<64x128xbf16>, vector<16x128xf32> -> vector<16x128xf32>
    %c0_15 = arith.constant 0 : index
    %c0_16 = arith.constant 0 : index
    %19 = vector.load %arg7[%c0_15, %c0_16] : memref<16x1xf32, #tpu.memory_space<vmem>>, vector<16x1xf32>
    %20 = vector.broadcast %19 : vector<16x1xf32> to vector<16x128xf32>
    %21 = arith.addf %18, %20 : vector<16x128xf32>
    %22 = tpu.iota {dimensions = array<i32: 0>} : vector<16x128xi32>
    %c8_i32 = arith.constant 8 : i32
    %23 = vector.broadcast %c8_i32 : i32 to vector<16x128xi32>
    %24 = arith.cmpi slt, %22, %23 : vector<16x128xi32>
    %25 = math.exp %21 : vector<16x128xf32>
    %26 = arith.select %24, %21, %25 : vector<16x128xi1>, vector<16x128xf32>
    %c0_17 = arith.constant 0 : index
    %c0_18 = arith.constant 0 : index
    %27 = vector.load %arg8[%c0_17, %c0_18] : memref<16x128xf32, #tpu.memory_space<vmem>>, vector<16x128xf32>
    tpu.vector_store %arg8[%c0_17, %c0_18], %26 {strides = array<i32>} : memref<16x128xf32, #tpu.memory_space<vmem>>, vector<16x128xf32>,
    return
  }
  func.func @transform_0(%arg0: i32) -> (i32, i32) {
    %c0_i32 = arith.constant 0 : i32
    %c0_i32_0 = arith.constant 0 : i32
    return %c0_i32, %arg0 : i32, i32
  }
  func.func @transform_1(%arg0: i32) -> (i32, i32) {
    %c0_i32 = arith.constant 0 : i32
    %c0_i32_0 = arith.constant 0 : i32
    %c0_i32_1 = arith.constant 0 : i32
    return %c0_i32, %c0_i32_0 : i32, i32
  }
  func.func @transform_2(%arg0: i32) -> (i32, i32) {
    %c0_i32 = arith.constant 0 : i32
    %c0_i32_0 = arith.constant 0 : i32
    %c0_i32_1 = arith.constant 0 : i32
    return %c0_i32, %c0_i32_0 : i32, i32
  }
  func.func @transform_3(%arg0: i32) -> (i32, i32) {
    %c0_i32 = arith.constant 0 : i32
    %c0_i32_0 = arith.constant 0 : i32
    %c0_i32_1 = arith.constant 0 : i32
    return %c0_i32, %c0_i32_0 : i32, i32
  }
  func.func @transform_4(%arg0: i32) -> (i32, i32) {
    %c0_i32 = arith.constant 0 : i32
    %c0_i32_0 = arith.constant 0 : i32
    %c0_i32_1 = arith.constant 0 : i32
    return %c0_i32, %c0_i32_0 : i32, i32
  }
  func.func @transform_5(%arg0: i32) -> (i32, i32) {
    %c0_i32 = arith.constant 0 : i32
    %c0_i32_0 = arith.constant 0 : i32
    %c0_i32_1 = arith.constant 0 : i32
    return %c0_i32, %c0_i32_0 : i32, i32
  }
  func.func @transform_6(%arg0: i32) -> (i32, i32) {
    %c0_i32 = arith.constant 0 : i32
    %c0_i32_0 = arith.constant 0 : i32
    %c0_i32_1 = arith.constant 0 : i32
    return %c0_i32, %c0_i32_0 : i32, i32
  }
  func.func @transform_7(%arg0: i32) -> (i32, i32) {
    %c0_i32 = arith.constant 0 : i32
    %c0_i32_0 = arith.constant 0 : i32
    return %c0_i32, %arg0 : i32, i32
  }
}

</mosaic_0001>

<bundles_post_ra>
// kernel: tpu_custom_call.1
= control target key start
LH: loop header
LB: loop body
LE: loop exit
PB: predicated region body
PF: predicated region fallthrough
CT: control target
= control target key end

     0   :  { %vm112_vm0 = vcmask 130048   ;;  %v579_v3 = vmov 0   ;;  %s730_s0 = inlined_call_operand.vmem [shape: bf16[16,128], index: 0, kind: input, shape index: {}]   ;;  %s731_s1 = inlined_call_operand.vmem [shape: bf16[64,16], index: 1, kind: input, shape index: {}]   ;;  %s732_s2 = inlined_call_operand.vmem [shape: bf16[64,64], index: 2, kind: input, shape index: {}]   ;;  %s733_s3 = inlined_call_operand.vmem [shape: bf16[16,64], index: 3, kind: input, shape index: {}]   ;;  %s734_s4 = inlined_call_operand.vmem [shape: f32[64,1], index: 4, kind: input, shape index: {}]   ;;  %s735_s5 = inlined_call_operand.vmem [shape: f32[64,1], index: 5, kind: input, shape index: {}]   ;;  %s736_s6 = inlined_call_operand.vmem [shape: f32[16,1], index: 6, kind: input, shape index: {}]   ;;  %s737_s7 = inlined_call_operand.hbm [shape: f32[16,128], index: 7, kind: output, shape index: {}]  }
   0x1   :  { %v543_v0 = vld [vmem:[%s730_s0] sm:$0xff]   ;;  %v545_v2 = vld [vmem:[%s731_s1 + $0x8] sm:$0xff]   ;;  %541 = vset.pattern.permute.xlu0 %v579_v3  ;;  %v546_v4 = vld [vmem:[%s731_s1 + $0x10] sm:$0xff]   ;;  %542 = vset.pattern.permute.xlu1 %v579_v3 }
   0x2   :  { %v544_v1 = vld [vmem:[%s731_s1] sm:$0xff]   ;;  %497 = vmatprep.subr.bf16.mxu0 %v543_v0  ;;  %v40_v6 = vld [vmem:[%s734_s4 + $0x10] sm:$0xff]  ;;  %v39_v7 = vld [vmem:[%s734_s4 + $0x8] sm:$0xff] }
   0x3   :  { %498 = vmatpush3.bf16.msra.mxu0 %v543_v0  ;;  %499 = vmatprep.mubr.msk.bf16.mxu0 %vm112_vm0, %v544_v1  ;;  %v38_v5 = vld [vmem:[%s734_s4] sm:$0xff]  ;;  %v41_v8 = vld [vmem:[%s734_s4 + $0x18] sm:$0xff]  ;;  %v43_v11 = vld [vmem:[%s734_s4 + $0x28] sm:$0xff] }
   0x4   :  { %48 = vperm.xlu0 %541, %v38_v5   ;;  %58 = vperm.xlu1 %542, %v40_v6   ;;  %v547_v9 = vld [vmem:[%s731_s1 + $0x18] sm:$0xff]   ;;  %v42_v10 = vld [vmem:[%s734_s4 + $0x20] sm:$0xff] }
   0x6   :  { %500 = vmatmul.mubr.msk.bf16.vlgmr.msra.gmra.mrb[0].mxu0 %vm112_vm0, %v545_v2 }
   0x7   :  { %503 = vmatprep.mubr.msk.bf16.mxu0 %vm112_vm0, %v546_v4 }
   0x8   :  { %53 = vperm.xlu0 %541, %v39_v7   ;;  %63 = vperm.xlu1 %542, %v41_v8  }
   0xc   :  { %68 = vperm.xlu0 %541, %v42_v10  }
   0xe   :  { %504 = vmatmul.mubr.msk.bf16.gmra.mrb[4].mxu0 %vm112_vm0, %v547_v9 }
   0xf   :  { %12 = vsyncpa [#allocation3], 0  ;;  %73 = vperm.xlu1 %542, %v43_v11   ;;  %v44_v12 = vld [vmem:[%s734_s4 + $0x30] sm:$0xff]  ;;  %v45_v13 = vld [vmem:[%s734_s4 + $0x38] sm:$0xff]  ;;  %vm278_vm1 = vcmask 523264   ;;  %v580_v0 = vmov 0.0  }
  0x10   :  { %78 = vperm.xlu0 %541, %v44_v12   ;;  %v210_v14 = vld [vmem:[%s735_s5] sm:$0xff]  ;;  %v211_v15 = vld [vmem:[%s735_s5 + $0x8] sm:$0xff]  ;;  %v212_v16 = vld [vmem:[%s735_s5 + $0x10] sm:$0xff]  ;;  %523 = vmatprep.subr.bf16.mxu0 %v580_v0  ;;  %vm581_vm2 = vmmov 0   ;;  %s582_s26 = smov [#allocation2]  }
  0x11   :  { %v213_v17 = vld [vmem:[%s735_s5 + $0x18] sm:$0xff]  ;;  %v214_v18 = vld [vmem:[%s735_s5 + $0x20] sm:$0xff]  ;;  %v215_v19 = vld [vmem:[%s735_s5 + $0x28] sm:$0xff]  ;;  %531 = vmatprep.mubr.msk.bf16.mxu0 %vm581_vm2, %v580_v0  ;;  %s449_s27 = sshll.u32 %s582_s26, 4  ;;  %s450_s27 = int_to_ptr.vmem [resolvable:$true] %s449_s27 }
  0x12   :  { %v216_v20 = vld [vmem:[%s735_s5 + $0x30] sm:$0xff]  ;;  %v217_v21 = vld [vmem:[%s735_s5 + $0x38] sm:$0xff]  ;;  %v371_v22 = vld [vmem:[%s736_s6 + $0x8] sm:$0xff]  ;;  %p560_p1 = scmp.lt.s32.totalorder %s450_s27, %s450_s27 }
  0x13   :  { %83 = vperm.xlu1 %542, %v45_v13   ;;  %v370_v23 = vld [vmem:[%s736_s6] sm:$0xff]  ;;  %v549_v61 = vld [vmem:[%s732_s2 + $0x8] sm:$0xff]   ;;  %v550_v62 = vld [vmem:[%s732_s2 + $0x10] sm:$0xff]  }
  0x14   :  { %220 = vperm.xlu0 %541, %v210_v14   ;;  %v548_v24 = vld [vmem:[%s732_s2] sm:$0xff]   ;;  %v551_v63 = vld [vmem:[%s732_s2 + $0x18] sm:$0xff]  }
  0x15   :  { %515 = vmatprep.mubr.msk.bf16.mxu1 %vm278_vm1, %v548_v24 }
  0x17   :  { %225 = vperm.xlu1 %542, %v211_v15  }
  0x18   :  { %230 = vperm.xlu0 %541, %v212_v16  }
  0x1b   :  { %235 = vperm.xlu1 %542, %v213_v17  }
  0x1c   :  { %240 = vperm.xlu0 %541, %v214_v18  }
  0x1f   :  { %245 = vperm.xlu1 %542, %v215_v19  }
  0x20   :  { %250 = vperm.xlu0 %541, %v216_v20  }
  0x23   :  { %255 = vperm.xlu1 %542, %v217_v21  }
  0x24   :  { %379 = vperm.xlu0 %541, %v371_v22  }
  0x27   :  { %374 = vperm.xlu1 %542, %v370_v23  }
  0x83   :  { %v49_v25 = vpop.permute.xlu0 %48  ;;  %v59_v26 = vpop.permute.xlu1 %58 }
  0x87   :  { %v54_v27 = vpop.permute.xlu0 %53  ;;  %v64_v28 = vpop.permute.xlu1 %63 }
  0x8b   :  { %v69_v32 = vpop.permute.xlu0 %68 }
  0x8e   :  { %v74_v37 = vpop.permute.xlu1 %73 }
  0x8f   :  { %v79_v44 = vpop.permute.xlu0 %78 }
  0x92   :  { %v84_v49 = vpop.permute.xlu1 %83 }
  0x93   :  { %v221_v1 = vpop.permute.xlu0 %220 }
  0x96   :  { %v226_v2 = vpop.permute.xlu1 %225 }
  0x97   :  { %v231_v3 = vpop.permute.xlu0 %230 }
  0x9a   :  { %v236_v4 = vpop.permute.xlu1 %235 }
  0x9b   :  { %v241_v8 = vpop.permute.xlu0 %240 }
  0x9e   :  { %v246_v13 = vpop.permute.xlu1 %245 }
  0x9f   :  { %v251_v20 = vpop.permute.xlu0 %250 }
  0xd9   :  { %v501_v29 = vpop.f32.mrb[0].mxu0 }
  0xda   :  { %v168_v30 = vadd.f32 %v501_v29, %v59_v26  ;;  %v159_v31 = vpop.f32.mrb[1].mxu0 }
  0xdb   :  { %v160_v33 = vadd.f32 %v159_v31, %v49_v25  ;;  %v502_v34 = vpop.f32.mrb[2].mxu0  ;;  %v256_v25 = vpop.permute.xlu1 %255 }
  0xdc   :  { %v171_v35 = vadd.f32 %v502_v34, %v64_v28  ;;  %v162_v36 = vpop.f32.mrb[3].mxu0  ;;  %v192_v39 = vmax.f32 %v168_v30, 0.0 }
  0xdd   :  { %v163_v38 = vadd.f32 %v162_v36, %v54_v27  ;;  %v190_v41 = vmax.f32 %v160_v33, 0.0 }
  0xde   :  { %v193_v40 = vmax.f32 %v171_v35, 0.0 }
  0xdf   :  { %v191_v42 = vmax.f32 %v163_v38, 0.0  ;;  %v375_v38 = vpop.permute.xlu1 %374 }
  0xe0   :  { %v199_v43 = vpack.c.bf16 %v193_v40, %v192_v39 }
  0xe1   :  { %v505_v45 = vpop.f32.mrb[4].mxu0  ;;  %v198_v46 = vpack.c.bf16 %v191_v42, %v190_v41  ;;  %v380_v42 = vpop.permute.xlu0 %379 }
  0xe2   :  { %v184_v47 = vadd.f32 %v505_v45, %v79_v44  ;;  %v175_v48 = vpop.f32.mrb[5].mxu0 }
  0xe3   :  { %v176_v50 = vadd.f32 %v175_v48, %v69_v32  ;;  %v506_v51 = vpop.f32.mrb[6].mxu0  ;;  %507 = vmatprep.subr.bf16.mxu1 %v198_v46 }
  0xe4   :  { %v187_v52 = vadd.f32 %v506_v51, %v84_v49  ;;  %v178_v53 = vpop.f32.mrb[7].mxu0  ;;  %508 = vmatpush3.bf16.msra.mxu1 %v198_v46  ;;  %v196_v55 = vmax.f32 %v184_v47, 0.0 }
  0xe5   :  { %v179_v54 = vadd.f32 %v178_v53, %v74_v37  ;;  %509 = vmatprep.subr.bf16.mxu1 %v199_v43  ;;  %v194_v57 = vmax.f32 %v176_v50, 0.0  ;;  %v552_v37 = vld [vmem:[%s733_s3] sm:$0xff]   ;;  %s555_s3 = scalar_lea.vmem %s450_s27, 256 }
  0xe6   :  { %v197_v56 = vmax.f32 %v187_v52, 0.0  ;;  %p556_p0 = scmp.ne.s32.totalorder %s450_s27, %s555_s3  ;;  %p561_p2 = scmp.lt.s32.totalorder %s555_s3, %s555_s3 }
  0xe7   :  { %v195_v58 = vmax.f32 %v179_v54, 0.0 }
  0xe8   :  { %v201_v59 = vpack.c.bf16 %v197_v56, %v196_v55  ;;  %510 = vmatpush3.bf16.msra.mxu1 %v199_v43  ;;  %p562_p3 = por %p561_p2, %p560_p1 }
  0xe9   :  { %v200_v60 = vpack.c.bf16 %v195_v58, %v194_v57 }
  0xea   :  { %p563_p4 = pnand %p562_p3, %p556_p0 }
  0xeb   :  { %511 = vmatprep.subr.bf16.mxu1 %v200_v60 }
  0xec   :  { %512 = vmatpush3.bf16.msra.mxu1 %v200_v60 }
  0xed   :  { %513 = vmatprep.subr.bf16.mxu1 %v201_v59 }
  0xf0   :  { %514 = vmatpush3.bf16.msra.mxu1 %v201_v59 }
  0xf3   :  { %516 = vmatmul.mubr.msk.bf16.vlgmr.msra.gmra.mrb[0].mxu1 %vm278_vm1, %v549_v61 }
  0xf4   :  { %519 = vmatprep.mubr.msk.bf16.mxu1 %vm278_vm1, %v550_v62 }
  0xfb   :  { %520 = vmatmul.mubr.msk.bf16.gmra.mrb[4].mxu1 %vm278_vm1, %v551_v63 }
 0x1c6   :  { %v517_v5 = vpop.f32.mrb[0].mxu1 }
 0x1c7   :  { %v334_v6 = vadd.f32 %v517_v5, %v231_v3  ;;  %v325_v7 = vpop.f32.mrb[1].mxu1 }
 0x1c8   :  { %v326_v9 = vadd.f32 %v325_v7, %v221_v1  ;;  %v518_v10 = vpop.f32.mrb[2].mxu1 }
 0x1c9   :  { %v337_v11 = vadd.f32 %v518_v10, %v236_v4  ;;  %v328_v12 = vpop.f32.mrb[3].mxu1  ;;  %v358_v15 = vmax.f32 %v334_v6, 0.0 }
 0x1ca   :  { %v329_v14 = vadd.f32 %v328_v12, %v226_v2  ;;  %v356_v17 = vmax.f32 %v326_v9, 0.0 }
 0x1cb   :  { %v359_v16 = vmax.f32 %v337_v11, 0.0 }
 0x1cc   :  { %v357_v18 = vmax.f32 %v329_v14, 0.0 }
 0x1cd   :  { %v367_v19 = vpack.c.bf16 %v359_v16, %v358_v15 }
 0x1ce   :  { %v366_v21 = vpack.c.bf16 %v357_v18, %v356_v17  ;;  %v521_v22 = vpop.f32.mrb[4].mxu1 }
 0x1cf   :  { %v350_v23 = vadd.f32 %v521_v22, %v251_v20  ;;  %v341_v24 = vpop.f32.mrb[5].mxu1 }
 0x1d0   :  { %v342_v26 = vadd.f32 %v341_v24, %v241_v8  ;;  %v522_v27 = vpop.f32.mrb[6].mxu1  ;;  %524 = vmatpush3.bf16.msra.mxu0 %v366_v21 }
 0x1d1   :  { %v353_v28 = vadd.f32 %v522_v27, %v256_v25  ;;  %v344_v29 = vpop.f32.mrb[7].mxu1  ;;  %525 = vmatprep.subr.bf16.mxu0 %v580_v0  ;;  %v362_v31 = vmax.f32 %v350_v23, 0.0 }
 0x1d2   :  { %v345_v30 = vadd.f32 %v344_v29, %v246_v13  ;;  %v360_v33 = vmax.f32 %v342_v26, 0.0 }
 0x1d3   :  { %v363_v32 = vmax.f32 %v353_v28, 0.0 }
 0x1d4   :  { %v361_v34 = vmax.f32 %v345_v30, 0.0  ;;  %526 = vmatpush3.bf16.msra.mxu0 %v367_v19 }
 0x1d5   :  { %v369_v35 = vpack.c.bf16 %v363_v32, %v362_v31  ;;  %527 = vmatprep.subr.bf16.mxu0 %v580_v0 }
 0x1d6   :  { %v368_v36 = vpack.c.bf16 %v361_v34, %v360_v33 }
 0x1d8   :  { %528 = vmatpush3.bf16.msra.mxu0 %v368_v36 }
 0x1d9   :  { %529 = vmatprep.subr.bf16.mxu0 %v580_v0 }
 0x1dc   :  { %530 = vmatpush3.bf16.msra.mxu0 %v369_v35 }
 0x1df   :  { %532 = vmatmul.mubr.msk.bf16.vlgmr.msra.gmra.mrb[8].mxu0 %vm278_vm1, %v552_v37 }
 0x2b2   :  { %v424_v39 = vpop.f32.mrb[8].mxu0 }
 0x2b3   :  { %v425_v40 = vadd.f32 %v424_v39, %v375_v38  ;;  %v533_v41 = vpop.f32.mrb[9].mxu0 }
 0x2b4   :  { %v427_v43 = vpop.f32.mrb[10].mxu0 }
 0x2b5   :  { %442 = vst [vmem:[#allocation2] sm:$0xff] %v425_v40  ;;  %v428_v44 = vadd.f32 %v427_v43, %v380_v42  ;;  %v534_v45 = vpop.f32.mrb[11].mxu0 }
 0x2b7   :  { %v438_v46 = vmul.f32 1.442695, %v428_v44 }
 0x2b9   :  { %553 = vpow2.f32 %v438_v46 }
 0x2c3   :  { %v554_v47 = vpop.eup %553 }
 0x2c4   :  { %443 = vst [vmem:[#allocation2 + $0x8] sm:$0xff] %v554_v47 }
 0x2c5   :  { %566 = shalt.err (!%p563_p4)
}
 0x2c6   :  { %s567_s30 = scalar_lea.hbm %s737_s7, 256 }
 0x2c7   :  { %p568_p5 = scmp.ne.s32.totalorder %s737_s7, %s567_s30  ;;  %p571_p6 = scmp.lt.u32.totalorder %s567_s30, %s737_s7 }
 0x2c9   :  { %p573_p7 = pnand %p571_p6, %p568_p5 }
 0x2cb   :  { %576 = shalt.err (!%p573_p7)
}
 0x2cc   :  { %s583_s10 = smov 128   ;;  %s584_s11 = smov 8  }
 0x2cd   :  { %455 = dma.vmem_to_hbm [thread:$0]  %s450_s27, 256, %s737_s7, [#allocation3], %s583_s10, %s583_s10, %s584_s11  }
 0x2ce   :  { %577 = dma.done.wait [#allocation3], 256  }
 0x2cf   :  { %578 = vsyncadd [#allocation3], 4294967040 }
 0x2d0   :  { %459 = vsyncpa [#allocation3], 1 }

</bundles_post_ra>
